<compile_context>
chip_gen: v7x
topology: tpu7x:2x2x1
jax: 0.10.0
libtpu: 0.0.40
codegen_flags: <defaults>
</compile_context>

<pallas_src>
from typing import NamedTuple

import jax
import jax.numpy as jnp
from jax.experimental import pallas as pl
from jax.experimental.pallas import tpu as pltpu

_MIB = 1024 * 1024


def _round_up(x, m):
    return (x + m - 1) // m * m


def _vmem_budget_bytes():
    """Usable per-core VMEM budget for this generation (leaves ~25% headroom for
    compiler scratch / semaphores): ~48 MiB on v7x (64 MiB/TC), ~96 MiB on v5e/v6e."""
    cap = 64 * _MIB
    try:
        v = getattr(pltpu.get_tpu_info(), "vmem_capacity_bytes", None)
        if v:
            cap = int(v)
    except Exception:
        pass
    return (cap * 3) // 4


def _vmem_limit(footprint, budget):
    return int(min(budget, max(int(footprint * 1.25), 32 * _MIB)))


# ---------------------------------------------------------------------------
# Parameter prep (one-time: transpose / 128-pad / optional bf16 cast)
# ---------------------------------------------------------------------------

class SoftmaxPredictorParams(NamedTuple):
    w_hv: jax.Array   # [H, V_pad] -- transposed (and optionally cast) once
    b_row: jax.Array  # [1, V_pad] float32; padded columns hold -1e30
    vocab_size: int   # true V (padded output is sliced back to this)


def prepare_params(weight, bias, *, compute_dtype=jnp.bfloat16):
    """weight: [V, H] (PyTorch nn.Linear layout), bias: [V].

    compute_dtype is the MXU input dtype (bf16 default: ~2-3x MXU throughput, half
    the weight HBM/VMEM traffic; accumulation and all softmax math stay f32, so the
    final log-prob error is ~1e-2 absolute).  Use jnp.float32 for exact results."""
    V, H = weight.shape
    V_pad = _round_up(V, 128)                      # only 128-round -- never tile-round
    w_hv = jnp.asarray(weight).T                   # [H, V]
    if compute_dtype is not None:
        w_hv = w_hv.astype(compute_dtype)
    b_row = jnp.asarray(bias, jnp.float32).reshape(1, V)
    if V_pad != V:
        w_hv = jnp.pad(w_hv, ((0, 0), (0, V_pad - V)))
        # Huge negative bias on padded columns => exp underflows to 0, so padding
        # never influences max / log-sum-exp.
        b_row = jnp.pad(b_row, ((0, 0), (0, V_pad - V)), constant_values=-1e30)
    return SoftmaxPredictorParams(w_hv, b_row, V)


# ---------------------------------------------------------------------------
# Kernels
# ---------------------------------------------------------------------------

def _fused_full_kernel(x_ref, w_ref, b_ref, o_ref):
    # Whole (padded) vocab in one lane block: MXU matmul + fused stable log-softmax.
    logits = jnp.dot(x_ref[...], w_ref[...], preferred_element_type=jnp.float32)
    logits = logits + b_ref[...]
    m = jnp.max(logits, axis=-1, keepdims=True)
    shifted = logits - m
    lse = jnp.log(jnp.sum(jnp.exp(shifted), axis=-1, keepdims=True))
    o_ref[...] = (shifted - lse).astype(o_ref.dtype)


def _make_resident_row_kernel(n_v, tv):
    """Single-pass tiled-V kernel: per-vocab-tile matmul into a VMEM-resident row slab
    + online max/sum-exp; normalization fused on the last vocab tile.  No logits HBM
    round trip, no second pallas_call."""

    def kernel(x_ref, w_ref, b_ref, o_ref, slab_ref, m_sc, l_sc):
        v = pl.program_id(1)

        @pl.when(v == 0)
        def _():
            m_sc[...] = jnp.full(m_sc.shape, -jnp.inf, dtype=m_sc.dtype)
            l_sc[...] = jnp.zeros(l_sc.shape, dtype=l_sc.dtype)

        logits = jnp.dot(x_ref[...], w_ref[...], preferred_element_type=jnp.float32)
        logits = logits + b_ref[...]
        slab_ref[v] = logits                       # page v of the resident f32 row slab

        m_prev = m_sc[...]
        m_new = jnp.maximum(m_prev, jnp.max(logits, axis=-1, keepdims=True))
        l_sc[...] = (l_sc[...] * jnp.exp(m_prev - m_new)
                     + jnp.sum(jnp.exp(logits - m_new), axis=-1, keepdims=True))
        m_sc[...] = m_new

        @pl.when(v == n_v - 1)
        def _():
            lse = m_sc[...] + jnp.log(l_sc[...])
            # Static, 128-aligned lane offsets -> plain unmasked vector stores.
            for u in range(n_v):
                o_ref[:, u * tv:(u + 1) * tv] = (slab_ref[u] - lse).astype(o_ref.dtype)

    return kernel


def _logits_stats_kernel(x_ref, w_ref, b_ref, logits_ref, lse_ref, m_sc, l_sc):
    # Two-pass fallback, pass 1: per-vocab-tile matmul, raw logits streamed out,
    # online running max / sum-exp in VMEM scratch, LSE finalized on the last tile.
    v = pl.program_id(1)

    @pl.when(v == 0)
    def _():
        m_sc[...] = jnp.full(m_sc.shape, -jnp.inf, dtype=m_sc.dtype)
        l_sc[...] = jnp.zeros(l_sc.shape, dtype=l_sc.dtype)

    logits = jnp.dot(x_ref[...], w_ref[...], preferred_element_type=jnp.float32)
    logits = logits + b_ref[...]
    logits_ref[...] = logits.astype(logits_ref.dtype)

    m_prev = m_sc[...]
    m_new = jnp.maximum(m_prev, jnp.max(logits, axis=-1, keepdims=True))
    l_sc[...] = (l_sc[...] * jnp.exp(m_prev - m_new)
                 + jnp.sum(jnp.exp(logits - m_new), axis=-1, keepdims=True))
    m_sc[...] = m_new

    @pl.when(v == pl.num_programs(1) - 1)
    def _():
        lse_ref[...] = m_sc[...] + jnp.log(l_sc[...])


def _normalize_kernel(logits_ref, lse_ref, o_ref):
    # Two-pass fallback, pass 2: elementwise  log_softmax = logits - lse.
    o_ref[...] = (logits_ref[...].astype(jnp.float32) - lse_ref[...]).astype(o_ref.dtype)


# ---------------------------------------------------------------------------
# Tile selection helpers
# ---------------------------------------------------------------------------

def _pick_tv(V_pad, H, wb, block_v, budget):
    """Largest multiple of 128 that divides V_pad, is <= block_v, and whose
    (double-buffered) weight block fits a third of the VMEM budget."""
    q = V_pad // 128
    d_cap = max(1, min(block_v // 128, q))
    for d in range(d_cap, 0, -1):
        if q % d == 0 and 2 * H * (d * 128) * wb <= budget // 3:
            return d * 128
    return 128


def _pick_tm(M, cap_rows, block_m):
    """Row tile from a VMEM-derived row cap; prefers no M padding. -> (tm, M_pad)."""
    cap = min(int(cap_rows), block_m)
    if cap < 8:
        return None, None
    if M <= cap:
        return M, M                                 # single full-extent row block
    lo = max(8, ((cap // 2) // 8) * 8)               # don't shrink below half the cap
    if M % 8 == 0:
        t = (cap // 8) * 8
        while t >= lo:
            if M % t == 0:
                return t, M                          # exact divisor -> no padding
            t -= 8
    t = (cap // 8) * 8
    return t, _round_up(M, t)


# ---------------------------------------------------------------------------
# Wrapper
# ---------------------------------------------------------------------------

def softmax_predictor(hidden_state, params: SoftmaxPredictorParams, *,
                      block_m=512, block_v=2048, out_dtype=None,
                      intermediate_dtype=jnp.float32, single_pass=None):
    """log_softmax(hidden_state @ W^T + b, axis=-1) with prepared params.

    hidden_state: [B, S, H]; returns [B, S, vocab_size] log-probabilities.
    single_pass: None = auto (HBM-traffic estimate), True/False force a scheme.
    intermediate_dtype: dtype of the pass-1 logits intermediate in the two-pass
    fallback (set to jnp.bfloat16 to halve its HBM traffic at ~1e-2 precision cost)."""
    B, S, H = hidden_state.shape
    V = params.vocab_size
    H_w, V_pad = params.w_hv.shape
    assert H_w == H, "hidden size mismatch between params and input"
    assert block_v % 128 == 0, "block_v must be a multiple of 128 lanes"

    out_dtype = jnp.dtype(hidden_state.dtype if out_dtype is None else out_dtype)
    intermediate_dtype = jnp.dtype(intermediate_dtype)

    M = B * S
    x = hidden_state.reshape(M, H)
    if x.dtype != params.w_hv.dtype:
        x = x.astype(params.w_hv.dtype)              # hoisted cast (bf16 MXU inputs)

    xb = x.dtype.itemsize
    wb = params.w_hv.dtype.itemsize
    ob = out_dtype.itemsize
    ib = intermediate_dtype.itemsize

    budget = _vmem_budget_bytes()
    slack = 2 * _MIB

    tv = _pick_tv(V_pad, H, wb, block_v, budget)
    n_v = V_pad // tv

    # --- VMEM footprints (per row of tm) and row-tile caps ---
    c_w = 2 * H * tv * wb + 2 * tv * 4 + slack       # weight + bias blocks (dbl-buffered)
    if n_v == 1:
        r1 = 2 * H * xb + 2 * V_pad * ob + 2 * V_pad * 4          # fused kernel
    else:
        r1 = 2 * H * xb + 2 * V_pad * ob + V_pad * 4 + 2 * tv * 4 + 16  # resident slab
    r2 = 2 * H * xb + 2 * tv * ib + 2 * tv * 4 + 8 + 16                 # two-pass pass 1
    cap1 = (budget - c_w) // r1 if budget > c_w else 0
    cap2 = (budget - c_w) // r2 if budget > c_w else 0

    tm1, Mp1 = _pick_tm(M, cap1, block_m)
    tm2, Mp2 = _pick_tm(M, cap2, block_m)

    # --- scheme selection by estimated HBM traffic ---
    def traffic1():
        n_m = Mp1 // tm1
        w_tr = H * V_pad * wb * (1 if n_v == 1 else n_m)   # n_v==1 => weight resident
        return w_tr + Mp1 * H * xb + Mp1 * V_pad * ob

    def traffic2():
        n_m = Mp2 // tm2
        return (n_m * H * V_pad * wb + Mp2 * H * xb
                + 2 * Mp2 * V_pad * ib + Mp2 * V_pad * ob)

    if single_pass is None:
        if tm1 is None and tm2 is None:
            # TODO(synk): add a K (hidden) grid axis with an f32 VMEM accumulator.
            raise NotImplementedError("hidden_size too large for the un-tiled K axis")
        if tm1 is None:
            use_single = False
        elif tm2 is None:
            use_single = True
        else:
            use_single = traffic1() <= traffic2()
    elif single_pass:
        if tm1 is None:
            raise ValueError("single_pass=True but the resident row slab does not fit VMEM")
        use_single = True
    else:
        if tm2 is None:
            raise ValueError("single_pass=False but the two-pass tiles do not fit VMEM")
        use_single = False

    tm, M_pad = (tm1, Mp1) if use_single else (tm2, Mp2)
    n_m = M_pad // tm
    if M_pad != M:
        x = jnp.pad(x, ((0, M_pad - M), (0, 0)))

    if use_single:
        if n_v == 1:
            # Fully fused: resident (H, V_pad) weight, one matmul + log-softmax per row tile.
            out = pl.pallas_call(
                _fused_full_kernel,
                out_shape=jax.ShapeDtypeStruct((M_pad, V_pad), out_dtype),
                grid_spec=pltpu.PrefetchScalarGridSpec(
                    num_scalar_prefetch=0,
                    grid=(n_m,),
                    in_specs=[
                        pl.BlockSpec((tm, H), lambda i: (i, 0)),
                        pl.BlockSpec((H, V_pad), lambda i: (0, 0)),   # resident weight
                        pl.BlockSpec((1, V_pad), lambda i: (0, 0)),
                    ],
                    out_specs=pl.BlockSpec((tm, V_pad), lambda i: (i, 0)),
                ),
                compiler_params=pltpu.CompilerParams(
                    dimension_semantics=("parallel",),
                    vmem_limit_bytes=_vmem_limit(c_w + tm * r1, budget),
                ),
            )(x, params.w_hv, params.b_row)
        else:
            # Single-pass tiled-V with VMEM-resident row slab (vocab axis last / arbitrary).
            out = pl.pallas_call(
                _make_resident_row_kernel(n_v, tv),
                out_shape=jax.ShapeDtypeStruct((M_pad, V_pad), out_dtype),
                grid_spec=pltpu.PrefetchScalarGridSpec(
                    num_scalar_prefetch=0,
                    grid=(n_m, n_v),
                    in_specs=[
                        pl.BlockSpec((tm, H), lambda i, v: (i, 0)),
                        pl.BlockSpec((H, tv), lambda i, v: (0, v)),
                        pl.BlockSpec((1, tv), lambda i, v: (0, v)),
                    ],
                    out_specs=pl.BlockSpec((tm, V_pad), lambda i, v: (i, 0)),
                    scratch_shapes=[
                        pltpu.VMEM((n_v, tm, tv), jnp.float32),   # resident raw-logit slab
                        pltpu.VMEM((tm, 1), jnp.float32),         # running max
                        pltpu.VMEM((tm, 1), jnp.float32),         # running sum-exp
                    ],
                ),
                compiler_params=pltpu.CompilerParams(
                    dimension_semantics=("parallel", "arbitrary"),
                    vmem_limit_bytes=_vmem_limit(c_w + tm * r1, budget),
                ),
            )(x, params.w_hv, params.b_row)
    else:
        # ---- Two-pass fallback (huge vocab): pass 1 = matmul + online LSE. ----
        logits, lse = pl.pallas_call(
            _logits_stats_kernel,
            out_shape=(jax.ShapeDtypeStruct((M_pad, V_pad), intermediate_dtype),
                       jax.ShapeDtypeStruct((M_pad, 1), jnp.float32)),
            grid_spec=pltpu.PrefetchScalarGridSpec(
                num_scalar_prefetch=0,
                grid=(n_m, n_v),                     # reduction (V) axis last
                in_specs=[
                    pl.BlockSpec((tm, H), lambda i, v: (i, 0)),
                    pl.BlockSpec((H, tv), lambda i, v: (0, v)),
                    pl.BlockSpec((1, tv), lambda i, v: (0, v)),
                ],
                out_specs=[
                    pl.BlockSpec((tm, tv), lambda i, v: (i, v)),
                    pl.BlockSpec((tm, 1), lambda i, v: (i, 0)),
                ],
                scratch_shapes=[pltpu.VMEM((tm, 1), jnp.float32),
                                pltpu.VMEM((tm, 1), jnp.float32)],
            ),
            compiler_params=pltpu.CompilerParams(
                dimension_semantics=("parallel", "arbitrary"),
                vmem_limit_bytes=_vmem_limit(c_w + tm * r2, budget),
            ),
        )(x, params.w_hv, params.b_row)

        # ---- Pass 2: pure elementwise normalize, large blocks, aliased output. ----
        q = V_pad // 128
        tv2 = 128
        for d in range(q, 0, -1):
            if q % d == 0 and 2 * tm * (d * 128) * (ib + ob + 4) + 2 * tm * 4 + slack <= budget:
                tv2 = d * 128
                break
        aliases = {0: 0} if intermediate_dtype == out_dtype else {}
        out = pl.pallas_call(
            _normalize_kernel,
            out_shape=jax.ShapeDtypeStruct((M_pad, V_pad), out_dtype),
            grid_spec=pltpu.PrefetchScalarGridSpec(
                num_scalar_prefetch=0,
                grid=(n_m, V_pad // tv2),
                in_specs=[
                    pl.BlockSpec((tm, tv2), lambda i, v: (i, v)),
                    pl.BlockSpec((tm, 1), lambda i, v: (i, 0)),
                ],
                out_specs=pl.BlockSpec((tm, tv2), lambda i, v: (i, v)),
            ),
            input_output_aliases=aliases,
            compiler_params=pltpu.CompilerParams(
                dimension_semantics=("parallel", "parallel"),
                vmem_limit_bytes=_vmem_limit(2 * tm * tv2 * (ib + ob + 4) + slack, budget),
            ),
        )(logits, lse)

    if M_pad != M or V_pad != V:
        out = out[:M, :V]
    return out.reshape(B, S, V)


# ---------------------------------------------------------------------------
# Self-test
# ---------------------------------------------------------------------------

if __name__ == "__main__":
    key = jax.random.PRNGKey(0)
    k_x, k_w, k_b, k_w2, k_b2 = jax.random.split(key, 5)

    # Toy config implied by the module: hidden_size=32, vocab_size=128.
    B, S, H, V = 2, 8, 32, 128
    hidden_state = jax.random.normal(k_x, (B, S, H), dtype=jnp.float32)
    bound = 1.0 / (H ** 0.5)
    weight = jax.random.uniform(k_w, (V, H), minval=-bound, maxval=bound, dtype=jnp.float32)
    bias = jax.random.uniform(k_b, (V,), minval=-bound, maxval=bound, dtype=jnp.float32)
    ref = jax.nn.log_softmax(hidden_state @ weight.T + bias, axis=-1)

    # ---- Test 1: exact f32 weights -> fully fused single-block path. ----
    params_f32 = prepare_params(weight, bias, compute_dtype=jnp.float32)
    out1 = softmax_predictor(hidden_state, params_f32)
    jax.block_until_ready(out1)
    assert out1.shape == (B, S, V)
    assert jnp.allclose(out1, ref, atol=1e-4, rtol=1e-4), "fused f32 path mismatch"

    # ---- Test 2: non-multiple-of-128 vocab + forced V tiling -> resident-row path. ----
    V2 = 320
    weight2 = jax.random.uniform(k_w2, (V2, H), minval=-bound, maxval=bound, dtype=jnp.float32)
    bias2 = jax.random.uniform(k_b2, (V2,), minval=-bound, maxval=bound, dtype=jnp.float32)
    ref2 = jax.nn.log_softmax(hidden_state @ weight2.T + bias2, axis=-1)
    params2 = prepare_params(weight2, bias2, compute_dtype=jnp.float32)
    out2 = softmax_predictor(hidden_state, params2, block_v=128, single_pass=True)
    jax.block_until_ready(out2)
    assert out2.shape == (B, S, V2)
    assert jnp.allclose(out2, ref2, atol=1e-4, rtol=1e-4), "resident-row path mismatch"

    # ---- Test 3: forced two-pass fallback (online LSE + aliased normalize pass). ----
    out3 = softmax_predictor(hidden_state, params2, block_v=128, single_pass=False)
    jax.block_until_ready(out3)
    assert jnp.allclose(out3, ref2, atol=1e-4, rtol=1e-4), "two-pass path mismatch"

    # ---- Test 4: default bf16 MXU inputs with f32 accumulation (loose tolerance). ----
    params_bf16 = prepare_params(weight, bias)   # compute_dtype defaults to bfloat16
    out4 = softmax_predictor(hidden_state, params_bf16)
    jax.block_until_ready(out4)
    assert out4.shape == (B, S, V)
    assert bool(jnp.max(jnp.abs(out4 - ref)) < 0.05), "bf16 path mismatch"

    print("KERNEL_OK")
</pallas_src>

<mosaic_0001>
module attributes {stable_mosaic.version = 11 : i64} {
  func.func @_fused_full_kernel(%arg0: i32, %arg1: memref<16x32xf32, #tpu.memory_space<vmem>>, %arg2: memref<32x128xf32, #tpu.memory_space<vmem>>, %arg3: memref<1x128xf32, #tpu.memory_space<vmem>>, %arg4: memref<16x128xf32, #tpu.memory_space<vmem>>) attributes {dimension_semantics = [#tpu.dimension_semantics<parallel>], iteration_bounds = array<i64: 1>, scalar_prefetch = 0 : i64, scratch_operands = 0 : i64, tpu.core_type = #tpu.core_type<tc>, window_params = [{transform_indices = @transform_0, window_bounds = array<i64: 16, 32>}, {pipeline_mode = #tpu.pipeline_mode<synchronous>, transform_indices = @transform_1, window_bounds = array<i64: 32, 128>}, {pipeline_mode = #tpu.pipeline_mode<synchronous>, transform_indices = @transform_2, window_bounds = array<i64: 1, 128>}, {transform_indices = @transform_3, window_bounds = array<i64: 16, 128>}]} {
    %c0 = arith.constant 0 : index
    %c0_0 = arith.constant 0 : index
    %0 = vector.load %arg1[%c0, %c0_0] : memref<16x32xf32, #tpu.memory_space<vmem>>, vector<16x32xf32>
    %c0_1 = arith.constant 0 : index
    %c0_2 = arith.constant 0 : index
    %1 = vector.load %arg2[%c0_1, %c0_2] : memref<32x128xf32, #tpu.memory_space<vmem>>, vector<32x128xf32>
    %cst = arith.constant dense<0.000000e+00> : vector<16x128xf32>
    %2 = tpu.matmul %0, %1, %cst {dimension_numbers = #tpu.dot_dimension_numbers<[1], [0], [0], [1], [0, 0, 1, 1], [], []>} : vector<16x32xf32>, vector<32x128xf32>, vector<16x128xf32> -> vector<16x128xf32>
    %c0_3 = arith.constant 0 : index
    %c0_4 = arith.constant 0 : index
    %3 = vector.load %arg3[%c0_3, %c0_4] : memref<1x128xf32, #tpu.memory_space<vmem>>, vector<1x128xf32>
    %4 = vector.broadcast %3 : vector<1x128xf32> to vector<16x128xf32>
    %5 = arith.addf %2, %4 : vector<16x128xf32>
    %cst_5 = arith.constant dense<0xFF800000> : vector<16xf32>
    %6 = vector.multi_reduction <maximumf>, %5, %cst_5 [1] : vector<16x128xf32> to vector<16xf32>
    %7 = vector.shape_cast %6 : vector<16xf32> to vector<16x1xf32>
    %8 = vector.broadcast %7 : vector<16x1xf32> to vector<16x128xf32>
    %9 = arith.subf %5, %8 : vector<16x128xf32>
    %10 = math.exp %9 : vector<16x128xf32>
    %cst_6 = arith.constant dense<0.000000e+00> : vector<16xf32>
    %11 = vector.multi_reduction <add>, %10, %cst_6 [1] : vector<16x128xf32> to vector<16xf32>
    %12 = vector.shape_cast %11 : vector<16xf32> to vector<16x1xf32>
    %13 = math.log %12 : vector<16x1xf32>
    %14 = vector.broadcast %13 : vector<16x1xf32> to vector<16x128xf32>
    %15 = arith.subf %9, %14 : vector<16x128xf32>
    %c0_7 = arith.constant 0 : index
    %c0_8 = arith.constant 0 : index
    %16 = vector.load %arg4[%c0_7, %c0_8] : memref<16x128xf32, #tpu.memory_space<vmem>>, vector<16x128xf32>
    tpu.vector_store %arg4[%c0_7, %c0_8], %15 {strides = array<i32>} : memref<16x128xf32, #tpu.memory_space<vmem>>, vector<16x128xf32>,
    return
  }
  func.func @transform_0(%arg0: i32) -> (i32, i32) {
    %c0_i32 = arith.constant 0 : i32
    %c0_i32_0 = arith.constant 0 : i32
    return %arg0, %c0_i32 : i32, i32
  }
  func.func @transform_1(%arg0: i32) -> (i32, i32) {
    %c0_i32 = arith.constant 0 : i32
    %c0_i32_0 = arith.constant 0 : i32
    %c0_i32_1 = arith.constant 0 : i32
    return %c0_i32, %c0_i32_0 : i32, i32
  }
  func.func @transform_2(%arg0: i32) -> (i32, i32) {
    %c0_i32 = arith.constant 0 : i32
    %c0_i32_0 = arith.constant 0 : i32
    %c0_i32_1 = arith.constant 0 : i32
    return %c0_i32, %c0_i32_0 : i32, i32
  }
  func.func @transform_3(%arg0: i32) -> (i32, i32) {
    %c0_i32 = arith.constant 0 : i32
    %c0_i32_0 = arith.constant 0 : i32
    return %arg0, %c0_i32 : i32, i32
  }
}

</mosaic_0001>

<bundles_post_ra>
// kernel: tpu_custom_call.1
= control target key start
LH: loop header
LB: loop body
LE: loop exit
PB: predicated region body
PF: predicated region fallthrough
CT: control target
= control target key end

     0   :  { %8 = vsyncpa [#allocation3], 0  ;;  %s364_s0 = inlined_call_operand.hbm [shape: f32[16,32], index: 0, kind: input, shape index: {}]   ;;  %s365_s1 = inlined_call_operand.hbm [shape: f32[32,128], index: 1, kind: input, shape index: {}]   ;;  %s366_s2 = inlined_call_operand.vmem [shape: f32[1,128], index: 2, kind: input, shape index: {}]   ;;  %s367_s3 = inlined_call_operand.hbm [shape: f32[16,128], index: 3, kind: output, shape index: {}]  }
   0x1   :  { %9 = vsyncpa [#allocation6], 0 }
   0x2   :  { %10 = vsyncpa [#allocation4], 0  ;;  %s291_s12 = smov [#allocation2]   ;;  %s219_s16 = scalar_lea.hbm %s364_s0, 256 }
   0x3   :  { %s16_s13 = sshll.u32 %s291_s12, 4  ;;  %p220_p0 = scmp.ne.s32.totalorder %s364_s0, %s219_s16  ;;  %s17_s13 = int_to_ptr.vmem [resolvable:$true] %s16_s13 }
   0x4   :  { %p223_p1 = scmp.lt.u32.totalorder %s219_s16, %s364_s0 }
   0x6   :  { %p225_p2 = pnand %p223_p1, %p220_p0 }
   0x8   :  { %228 = shalt.err (!%p225_p2)
}
   0x9   :  { %s229_s21 = scalar_lea.vmem %s17_s13, 256  ;;  %p234_p4 = scmp.lt.s32.totalorder %s17_s13, %s17_s13 }
   0xa   :  { %p230_p3 = scmp.ne.s32.totalorder %s17_s13, %s229_s21  ;;  %p235_p5 = scmp.lt.s32.totalorder %s229_s21, %s229_s21 }
   0xc   :  { %p236_p6 = por %p235_p5, %p234_p4 }
   0xe   :  { %p237_p7 = pnand %p236_p6, %p230_p3 }
  0x10   :  { %240 = shalt.err (!%p237_p7)
}
  0x11   :  { %s292_s22 = smov 128   ;;  %s293_s23 = smov 8  }
  0x12   :  { %22 = dma.hbm_to_vmem [thread:$0]  %s364_s0, 256, %s17_s13, [#allocation3], %s292_s22, %s292_s22, %s293_s23  }
  0x13   :  { %s294_s26 = smov [#allocation5]   ;;  %s241_s30 = scalar_lea.hbm %s365_s1, 512 }
  0x14   :  { %s28_s27 = sshll.u32 %s294_s26, 4  ;;  %p242_p8 = scmp.ne.s32.totalorder %s365_s1, %s241_s30  ;;  %s29_s27 = int_to_ptr.vmem [resolvable:$true] %s28_s27 }
  0x15   :  { %p245_p9 = scmp.lt.u32.totalorder %s241_s30, %s365_s1 }
  0x17   :  { %p247_p10 = pnand %p245_p9, %p242_p8 }
  0x19   :  { %250 = shalt.err (!%p247_p10)
}
  0x1a   :  { %s251_s8 = scalar_lea.vmem %s29_s27, 512  ;;  %p256_p12 = scmp.lt.s32.totalorder %s29_s27, %s29_s27 }
  0x1b   :  { %p252_p11 = scmp.ne.s32.totalorder %s29_s27, %s251_s8  ;;  %p257_p13 = scmp.lt.s32.totalorder %s251_s8, %s251_s8 }
  0x1d   :  { %p258_p0 = por %p257_p13, %p256_p12 }
  0x1f   :  { %p259_p1 = pnand %p258_p0, %p252_p11 }
  0x21   :  { %262 = shalt.err (!%p259_p1)
}
  0x22   :  { %34 = dma.hbm_to_vmem [thread:$0]  %s365_s1, 512, %s29_s27, [#allocation6], %s292_s22, %s292_s22, %s293_s23  }
  0x23   :  { %285 = dma.done.wait [#allocation3], 256  }
  0x24   :  { %286 = vsyncadd [#allocation3], 4294967040 }
  0x25   :  { %287 = dma.done.wait [#allocation6], 512  }
  0x26   :  { %288 = vsyncadd [#allocation6], 4294966784  ;;  %vm56_vm0 = vcmask 261120   ;;  %v45_v0 = vld [vmem:[#allocation5] sm:$0xff]  ;;  %v46_v1 = vld [vmem:[#allocation5 + $0x8] sm:$0xff] }
  0x27   :  { %v47_v2 = vld [vmem:[#allocation5 + $0x10] sm:$0xff]  ;;  %v198_v3 = vpack.c.bf16 %v46_v1, %v45_v0  ;;  %v48_v4 = vld [vmem:[#allocation5 + $0x18] sm:$0xff] }
  0x28   :  { %v43_v5 = vld [vmem:[#allocation2] sm:$0xff]  ;;  %v202_v6 = vpack.c.bf16 %v48_v4, %v47_v2  ;;  %v44_v7 = vld [vmem:[#allocation2 + $0x8] sm:$0xff] }
  0x29   :  { %195 = vmatprep.mubr.msk.f32.mxu0 %vm56_vm0, %v43_v5  ;;  %199 = vmatprep.subr.bf16.mxu0 %v198_v3  ;;  %v178_v8 = vld [vmem:[%s366_s2] ss:$0 sm:$0xff]  ;;  %s295_s2 = smov [#allocation7]  }
  0x2a   :  { %201 = vmatpush3.bf16.msra.mxu0 %v198_v3  ;;  %s165_s11 = sshll.u32 %s295_s2, 4  ;;  %s166_s11 = int_to_ptr.vmem [resolvable:$true] %s165_s11 }
  0x2b   :  { %203 = vmatprep.subr.bf16.mxu0 %v202_v6  ;;  %s263_s12 = scalar_lea.vmem %s166_s11, 256  ;;  %p268_p3 = scmp.lt.s32.totalorder %s166_s11, %s166_s11 }
  0x2c   :  { %p264_p2 = scmp.ne.s32.totalorder %s166_s11, %s263_s12  ;;  %p269_p4 = scmp.lt.s32.totalorder %s263_s12, %s263_s12 }
  0x2e   :  { %205 = vmatpush3.bf16.msra.mxu0 %v202_v6  ;;  %p270_p5 = por %p269_p4, %p268_p3 }
  0x30   :  { %p271_p6 = pnand %p270_p5, %p264_p2 }
  0x31   :  { %196 = vmatmul.mubr.msk.f32.vlgmr.msra.gmra.mrb[0].mxu0 %vm56_vm0, %v44_v7 }
 0x104   :  { %v197_v9 = vpop.f32.mrb[0].mxu0 }
 0x105   :  { %v129_v10 = vpop.f32.mrb[1].mxu0  ;;  %v135_v12 = vadd.f32 %v197_v9, %v178_v8 }
 0x106   :  { %v130_v11 = vadd.f32 %v178_v8, %v129_v10 }
 0x108   :  { %138 = vmax.xlane.f32.xlu0 %v130_v11 }
 0x10c   :  { %140 = vmax.xlane.f32.xlu0 %v135_v12 }
 0x195   :  { %v139_v13 = vpop.xlane.xlu0 %138 }
 0x196   :  { %v142_v14 = vsub.f32 %v130_v11, %v139_v13 }
 0x198   :  { %v144_v15 = vmul.f32 1.442695, %v142_v14 }
 0x199   :  { %v141_v16 = vpop.xlane.xlu0 %140 }
 0x19a   :  { %v143_v17 = vsub.f32 %v135_v12, %v141_v16  ;;  %211 = vpow2.f32 %v144_v15 }
 0x19c   :  { %v146_v18 = vmul.f32 1.442695, %v143_v17 }
 0x19e   :  { %213 = vpow2.f32 %v146_v18 }
 0x1a4   :  { %v212_v19 = vpop.eup %211 }
 0x1a5   :  { %148 = vadd.xlane.f32.xlu1 %v212_v19 }
 0x1a8   :  { %v214_v20 = vpop.eup %213 }
 0x1a9   :  { %150 = vadd.xlane.f32.xlu1 %v214_v20 }
 0x232   :  { %v149_v21 = vpop.xlane.xlu1 %148 }
 0x233   :  { %215 = vlog2.f32 %v149_v21 }
 0x236   :  { %v151_v22 = vpop.xlane.xlu1 %150 }
 0x237   :  { %217 = vlog2.f32 %v151_v22 }
 0x23d   :  { %v216_v23 = vpop.eup %215 }
 0x23e   :  { %v153_v24 = vmul.f32 0.6931472, %v216_v23 }
 0x240   :  { %v156_v25 = vsub.f32 %v142_v14, %v153_v24 }
 0x241   :  { %v218_v26 = vpop.eup %217 }
 0x242   :  { %158 = vst [vmem:[#allocation7] sm:$0xff] %v156_v25  ;;  %v155_v27 = vmul.f32 0.6931472, %v218_v26 }
 0x244   :  { %v157_v28 = vsub.f32 %v143_v17, %v155_v27 }
 0x246   :  { %159 = vst [vmem:[#allocation7 + $0x8] sm:$0xff] %v157_v28 }
 0x247   :  { %274 = shalt.err (!%p271_p6)
}
 0x248   :  { %s275_s15 = scalar_lea.hbm %s367_s3, 256 }
 0x249   :  { %p276_p7 = scmp.ne.s32.totalorder %s367_s3, %s275_s15  ;;  %p279_p8 = scmp.lt.u32.totalorder %s275_s15, %s367_s3 }
 0x24b   :  { %p281_p9 = pnand %p279_p8, %p276_p7 }
 0x24d   :  { %284 = shalt.err (!%p281_p9)
}
 0x24e   :  { %171 = dma.vmem_to_hbm [thread:$0]  %s166_s11, 256, %s367_s3, [#allocation4], %s292_s22, %s292_s22, %s293_s23  }
 0x24f   :  { %289 = dma.done.wait [#allocation4], 256  }
 0x250   :  { %290 = vsyncadd [#allocation4], 4294967040 }
 0x251   :  { %175 = vsyncpa [#allocation3], 1 }
 0x252   :  { %176 = vsyncpa [#allocation6], 1 }
 0x253   :  { %177 = vsyncpa [#allocation4], 1 }

</bundles_post_ra>
